<compile_context>
chip_gen: v6e
topology: v6e:2x2x1
jax: 0.10.0
libtpu: 0.0.40
codegen_flags: <defaults>
</compile_context>

<pallas_src>
import jax
import jax.numpy as jnp
from jax.experimental import pallas as pl
from jax.experimental.pallas import tpu as pltpu

LANE = 128


def s3_kernel(fusion_ref, audio_ref, w_ref, b_ref, alpha_ref, out_ref):
    # fusion_ref / audio_ref / out_ref : (C, tile_r, 128) VMEM, dense slabs
    # w_ref : (C, C) SMEM   -- conv1x1 weight [out, in]
    # b_ref : (C,)   SMEM   -- conv1x1 bias
    # alpha_ref : (1,) SMEM -- shared PReLU slope (single-parameter nn.PReLU())
    C = out_ref.shape[0]
    h = C // 2
    alpha = alpha_ref[0]

    # PReLU on each channel; each channel is a dense (tile_r, 128) slab.
    xs = []
    for i in range(C):
        xi = fusion_ref[i].astype(jnp.float32)
        xs.append(jnp.where(xi >= 0.0, xi, alpha * xi))

    # 1x1 conv as C*C scalar-broadcast VPU FMAs (weights from SMEM), + bias, ReLU.
    # C=4 would use <2% of the MXU, so keep this on the VPU.
    ms = []
    for o in range(C):
        acc = xs[0] * w_ref[o, 0]
        for i in range(1, C):
            acc = acc + xs[i] * w_ref[o, i]
        ms.append(jnp.maximum(acc + b_ref[o], 0.0))

    # Complex mix; dense full-slab stores directly into the output channels.
    for j in range(h):
        ar = audio_ref[j].astype(jnp.float32)
        ai = audio_ref[j + h].astype(jnp.float32)
        mr, mi = ms[j], ms[j + h]
        out_ref[j] = (mr * ar - mi * ai).astype(out_ref.dtype)
        out_ref[j + h] = (mr * ai + mi * ar).astype(out_ref.dtype)


def _pick_tile_r(R, B, C, elem_bytes=4, target_block_bytes=2 << 20):
    """Rows of 128 lanes per block: ~2 MiB per streamed input block, a multiple
    of 8 (sublane tiling) or the full extent, with >= 4 total grid steps when
    possible so both v7x TensorCores get work."""
    t = max(8, target_block_bytes // (C * LANE * elem_bytes))
    t = (t // 8) * 8
    if R <= t:
        return R                                     # full extent along rows
    t = max(8, min(t, (R // 8) * 8))
    while B * ((R + t - 1) // t) < 4 and t > 8:
        t_new = max(8, ((t // 2) // 8) * 8)
        if t_new == t:
            break
        t = t_new
    return t


def s3_block(encoded_audio, fusion, weight, bias, alpha):
    """encoded_audio, fusion: (B, C, T, F) NCHW.  Returns (B, C, T, F)."""
    B, C, T, F = encoded_audio.shape
    assert C % 2 == 0, "num_audio_channels must be even (real/imag split)"
    N = T * F

    # Free reshapes: put T*F on the lane axis, split into (R, 128) so every
    # per-channel slab is lane- and sublane-dense.  Pad N to a multiple of 128
    # only if needed (rare; avoids masked partial stores).
    n_pad = ((N + LANE - 1) // LANE) * LANE
    ea = encoded_audio.reshape(B, C, N)
    fu = fusion.reshape(B, C, N)
    if n_pad != N:
        ea = jnp.pad(ea, ((0, 0), (0, 0), (0, n_pad - N)))
        fu = jnp.pad(fu, ((0, 0), (0, 0), (0, n_pad - N)))
    R = n_pad // LANE
    ea = ea.reshape(B, C, R, LANE)
    fu = fu.reshape(B, C, R, LANE)

    w = weight.reshape(C, C).astype(jnp.float32)        # (out, in)
    b = bias.reshape(C).astype(jnp.float32)
    a = jnp.reshape(alpha, (1,)).astype(jnp.float32)

    elem_bytes = jnp.dtype(encoded_audio.dtype).itemsize
    tile_r = _pick_tile_r(R, B, C, elem_bytes)
    grid = (B, pl.cdiv(R, tile_r))

    # C untiled on a leading block dim; dense (tile_r, 128) trailing slabs.
    data_spec = pl.BlockSpec((None, C, tile_r, LANE), lambda bi, ri: (bi, 0, ri, 0))
    smem_spec = pl.BlockSpec(memory_space=pltpu.MemorySpace.SMEM)

    out = pl.pallas_call(
        s3_kernel,
        out_shape=jax.ShapeDtypeStruct((B, C, R, LANE), encoded_audio.dtype),
        grid=grid,
        in_specs=[
            data_spec,   # fusion        (B, C, R, 128)
            data_spec,   # encoded audio (B, C, R, 128)
            smem_spec,   # conv weight   (C, C)
            smem_spec,   # conv bias     (C,)
            smem_spec,   # PReLU alpha   (1,)
        ],
        out_specs=data_spec,
        compiler_params=pltpu.CompilerParams(
            dimension_semantics=("parallel", "parallel"),
            # ~2 MiB/block * 3 streams * 2 pipeline buffers + compute
            # intermediates; 48 MiB leaves headroom and fits v7x's 64 MiB VMEM.
            vmem_limit_bytes=48 * 1024 * 1024,
        ),
    )(fu, ea, w, b, a)

    out = out.reshape(B, C, n_pad)
    if n_pad != N:
        out = out[:, :, :N]
    return out.reshape(B, C, T, F)


def s3_block_ref(encoded_audio, fusion, weight, bias, alpha):
    """Pure-JAX reference mirroring the PyTorch forward."""
    B, C, T, F = encoded_audio.shape
    x = jnp.where(fusion >= 0, fusion, alpha * fusion)                    # PReLU
    mask = jnp.einsum("oi,bitf->botf", weight.reshape(C, C), x) + bias.reshape(1, C, 1, 1)
    mask = jnp.maximum(mask, 0.0)                                         # ReLU
    h = C // 2
    mr, mi = mask[:, :h], mask[:, h:]
    ar, ai = encoded_audio[:, :h], encoded_audio[:, h:]
    return jnp.concatenate([mr * ar - mi * ai, mr * ai + mi * ar], axis=1)


if __name__ == "__main__":
    B, C, T, F = 2, 4, 16, 16       # num_audio_channels = 4
    key = jax.random.PRNGKey(0)
    k1, k2, k3, k4 = jax.random.split(key, 4)

    encoded_audio = jax.random.normal(k1, (B, C, T, F), dtype=jnp.float32)
    fusion = jax.random.normal(k2, (B, C, T, F), dtype=jnp.float32)

    # Deterministic synthetic parameters (shapes from nn.Conv2d(C, C, 1) + nn.PReLU()).
    weight = jax.random.normal(k3, (C, C, 1, 1), dtype=jnp.float32) * 0.3
    bias = jax.random.normal(k4, (C,), dtype=jnp.float32) * 0.1
    alpha = jnp.float32(0.25)       # PReLU default init

    out = s3_block(encoded_audio, fusion, weight, bias, alpha)
    out = jax.block_until_ready(out)

    ref = s3_block_ref(encoded_audio, fusion, weight, bias, alpha)
    assert out.shape == (B, C, T, F)
    assert jnp.allclose(out, ref, atol=1e-5, rtol=1e-5), "mismatch vs reference"

    print("KERNEL_OK")
</pallas_src>

<mosaic_0001>
module attributes {stable_mosaic.version = 11 : i64} {
  func.func @s3_kernel(%arg0: i32, %arg1: i32, %arg2: memref<1x4x2x128xf32, #tpu.memory_space<vmem>>, %arg3: memref<1x4x2x128xf32, #tpu.memory_space<vmem>>, %arg4: memref<4x4xf32, #tpu.memory_space<smem>>, %arg5: memref<4xf32, #tpu.memory_space<smem>>, %arg6: memref<1xf32, #tpu.memory_space<smem>>, %arg7: memref<1x4x2x128xf32, #tpu.memory_space<vmem>>) attributes {dimension_semantics = [#tpu.dimension_semantics<parallel>, #tpu.dimension_semantics<parallel>], iteration_bounds = array<i64: 2, 1>, scalar_prefetch = 0 : i64, scratch_operands = 0 : i64, tpu.core_type = #tpu.core_type<tc>, window_params = [{transform_indices = @transform_0, window_bounds = array<i64: 1, 4, 2, 128>}, {transform_indices = @transform_1, window_bounds = array<i64: 1, 4, 2, 128>}, {transform_indices = @transform_2, window_bounds = array<i64: 4, 4>}, {transform_indices = @transform_3, window_bounds = array<i64: 4>}, {transform_indices = @transform_4, window_bounds = array<i64: 1>}, {transform_indices = @transform_5, window_bounds = array<i64: 1, 4, 2, 128>}]} {
    %c0 = arith.constant 0 : index
    %0 = memref.load %arg6[%c0] : memref<1xf32, #tpu.memory_space<smem>>
    %c0_0 = arith.constant 0 : index
    %c0_1 = arith.constant 0 : index
    %c0_2 = arith.constant 0 : index
    %c0_3 = arith.constant 0 : index
    %1 = vector.load %arg2[%c0_0, %c0_1, %c0_2, %c0_3] : memref<1x4x2x128xf32, #tpu.memory_space<vmem>>, vector<1x1x2x128xf32>
    %2 = vector.shape_cast %1 : vector<1x1x2x128xf32> to vector<2x128xf32>
    %cst = arith.constant 0.000000e+00 : f32
    %3 = vector.broadcast %cst : f32 to vector<2x128xf32>
    %4 = arith.cmpf oge, %2, %3 : vector<2x128xf32>
    %5 = vector.broadcast %0 : f32 to vector<2x128xf32>
    %6 = arith.mulf %5, %2 : vector<2x128xf32>
    %7 = arith.select %4, %2, %6 : vector<2x128xi1>, vector<2x128xf32>
    %c0_4 = arith.constant 0 : index
    %c1 = arith.constant 1 : index
    %c0_5 = arith.constant 0 : index
    %c0_6 = arith.constant 0 : index
    %8 = vector.load %arg2[%c0_4, %c1, %c0_5, %c0_6] : memref<1x4x2x128xf32, #tpu.memory_space<vmem>>, vector<1x1x2x128xf32>
    %9 = vector.shape_cast %8 : vector<1x1x2x128xf32> to vector<2x128xf32>
    %cst_7 = arith.constant 0.000000e+00 : f32
    %10 = vector.broadcast %cst_7 : f32 to vector<2x128xf32>
    %11 = arith.cmpf oge, %9, %10 : vector<2x128xf32>
    %12 = vector.broadcast %0 : f32 to vector<2x128xf32>
    %13 = arith.mulf %12, %9 : vector<2x128xf32>
    %14 = arith.select %11, %9, %13 : vector<2x128xi1>, vector<2x128xf32>
    %c0_8 = arith.constant 0 : index
    %c2 = arith.constant 2 : index
    %c0_9 = arith.constant 0 : index
    %c0_10 = arith.constant 0 : index
    %15 = vector.load %arg2[%c0_8, %c2, %c0_9, %c0_10] : memref<1x4x2x128xf32, #tpu.memory_space<vmem>>, vector<1x1x2x128xf32>
    %16 = vector.shape_cast %15 : vector<1x1x2x128xf32> to vector<2x128xf32>
    %cst_11 = arith.constant 0.000000e+00 : f32
    %17 = vector.broadcast %cst_11 : f32 to vector<2x128xf32>
    %18 = arith.cmpf oge, %16, %17 : vector<2x128xf32>
    %19 = vector.broadcast %0 : f32 to vector<2x128xf32>
    %20 = arith.mulf %19, %16 : vector<2x128xf32>
    %21 = arith.select %18, %16, %20 : vector<2x128xi1>, vector<2x128xf32>
    %c0_12 = arith.constant 0 : index
    %c3 = arith.constant 3 : index
    %c0_13 = arith.constant 0 : index
    %c0_14 = arith.constant 0 : index
    %22 = vector.load %arg2[%c0_12, %c3, %c0_13, %c0_14] : memref<1x4x2x128xf32, #tpu.memory_space<vmem>>, vector<1x1x2x128xf32>
    %23 = vector.shape_cast %22 : vector<1x1x2x128xf32> to vector<2x128xf32>
    %cst_15 = arith.constant 0.000000e+00 : f32
    %24 = vector.broadcast %cst_15 : f32 to vector<2x128xf32>
    %25 = arith.cmpf oge, %23, %24 : vector<2x128xf32>
    %26 = vector.broadcast %0 : f32 to vector<2x128xf32>
    %27 = arith.mulf %26, %23 : vector<2x128xf32>
    %28 = arith.select %25, %23, %27 : vector<2x128xi1>, vector<2x128xf32>
    %c0_16 = arith.constant 0 : index
    %c0_17 = arith.constant 0 : index
    %29 = memref.load %arg4[%c0_16, %c0_17] : memref<4x4xf32, #tpu.memory_space<smem>>
    %30 = vector.broadcast %29 : f32 to vector<2x128xf32>
    %31 = arith.mulf %7, %30 : vector<2x128xf32>
    %c0_18 = arith.constant 0 : index
    %c1_19 = arith.constant 1 : index
    %32 = memref.load %arg4[%c0_18, %c1_19] : memref<4x4xf32, #tpu.memory_space<smem>>
    %33 = vector.broadcast %32 : f32 to vector<2x128xf32>
    %34 = arith.mulf %14, %33 : vector<2x128xf32>
    %35 = arith.addf %31, %34 : vector<2x128xf32>
    %c0_20 = arith.constant 0 : index
    %c2_21 = arith.constant 2 : index
    %36 = memref.load %arg4[%c0_20, %c2_21] : memref<4x4xf32, #tpu.memory_space<smem>>
    %37 = vector.broadcast %36 : f32 to vector<2x128xf32>
    %38 = arith.mulf %21, %37 : vector<2x128xf32>
    %39 = arith.addf %35, %38 : vector<2x128xf32>
    %c0_22 = arith.constant 0 : index
    %c3_23 = arith.constant 3 : index
    %40 = memref.load %arg4[%c0_22, %c3_23] : memref<4x4xf32, #tpu.memory_space<smem>>
    %41 = vector.broadcast %40 : f32 to vector<2x128xf32>
    %42 = arith.mulf %28, %41 : vector<2x128xf32>
    %43 = arith.addf %39, %42 : vector<2x128xf32>
    %c0_24 = arith.constant 0 : index
    %44 = memref.load %arg5[%c0_24] : memref<4xf32, #tpu.memory_space<smem>>
    %45 = vector.broadcast %44 : f32 to vector<2x128xf32>
    %46 = arith.addf %43, %45 : vector<2x128xf32>
    %cst_25 = arith.constant 0.000000e+00 : f32
    %47 = vector.broadcast %cst_25 : f32 to vector<2x128xf32>
    %48 = arith.maximumf %46, %47 : vector<2x128xf32>
    %c1_26 = arith.constant 1 : index
    %c0_27 = arith.constant 0 : index
    %49 = memref.load %arg4[%c1_26, %c0_27] : memref<4x4xf32, #tpu.memory_space<smem>>
    %50 = vector.broadcast %49 : f32 to vector<2x128xf32>
    %51 = arith.mulf %7, %50 : vector<2x128xf32>
    %c1_28 = arith.constant 1 : index
    %c1_29 = arith.constant 1 : index
    %52 = memref.load %arg4[%c1_28, %c1_29] : memref<4x4xf32, #tpu.memory_space<smem>>
    %53 = vector.broadcast %52 : f32 to vector<2x128xf32>
    %54 = arith.mulf %14, %53 : vector<2x128xf32>
    %55 = arith.addf %51, %54 : vector<2x128xf32>
    %c1_30 = arith.constant 1 : index
    %c2_31 = arith.constant 2 : index
    %56 = memref.load %arg4[%c1_30, %c2_31] : memref<4x4xf32, #tpu.memory_space<smem>>
    %57 = vector.broadcast %56 : f32 to vector<2x128xf32>
    %58 = arith.mulf %21, %57 : vector<2x128xf32>
    %59 = arith.addf %55, %58 : vector<2x128xf32>
    %c1_32 = arith.constant 1 : index
    %c3_33 = arith.constant 3 : index
    %60 = memref.load %arg4[%c1_32, %c3_33] : memref<4x4xf32, #tpu.memory_space<smem>>
    %61 = vector.broadcast %60 : f32 to vector<2x128xf32>
    %62 = arith.mulf %28, %61 : vector<2x128xf32>
    %63 = arith.addf %59, %62 : vector<2x128xf32>
    %c1_34 = arith.constant 1 : index
    %64 = memref.load %arg5[%c1_34] : memref<4xf32, #tpu.memory_space<smem>>
    %65 = vector.broadcast %64 : f32 to vector<2x128xf32>
    %66 = arith.addf %63, %65 : vector<2x128xf32>
    %cst_35 = arith.constant 0.000000e+00 : f32
    %67 = vector.broadcast %cst_35 : f32 to vector<2x128xf32>
    %68 = arith.maximumf %66, %67 : vector<2x128xf32>
    %c2_36 = arith.constant 2 : index
    %c0_37 = arith.constant 0 : index
    %69 = memref.load %arg4[%c2_36, %c0_37] : memref<4x4xf32, #tpu.memory_space<smem>>
    %70 = vector.broadcast %69 : f32 to vector<2x128xf32>
    %71 = arith.mulf %7, %70 : vector<2x128xf32>
    %c2_38 = arith.constant 2 : index
    %c1_39 = arith.constant 1 : index
    %72 = memref.load %arg4[%c2_38, %c1_39] : memref<4x4xf32, #tpu.memory_space<smem>>
    %73 = vector.broadcast %72 : f32 to vector<2x128xf32>
    %74 = arith.mulf %14, %73 : vector<2x128xf32>
    %75 = arith.addf %71, %74 : vector<2x128xf32>
    %c2_40 = arith.constant 2 : index
    %c2_41 = arith.constant 2 : index
    %76 = memref.load %arg4[%c2_40, %c2_41] : memref<4x4xf32, #tpu.memory_space<smem>>
    %77 = vector.broadcast %76 : f32 to vector<2x128xf32>
    %78 = arith.mulf %21, %77 : vector<2x128xf32>
    %79 = arith.addf %75, %78 : vector<2x128xf32>
    %c2_42 = arith.constant 2 : index
    %c3_43 = arith.constant 3 : index
    %80 = memref.load %arg4[%c2_42, %c3_43] : memref<4x4xf32, #tpu.memory_space<smem>>
    %81 = vector.broadcast %80 : f32 to vector<2x128xf32>
    %82 = arith.mulf %28, %81 : vector<2x128xf32>
    %83 = arith.addf %79, %82 : vector<2x128xf32>
    %c2_44 = arith.constant 2 : index
    %84 = memref.load %arg5[%c2_44] : memref<4xf32, #tpu.memory_space<smem>>
    %85 = vector.broadcast %84 : f32 to vector<2x128xf32>
    %86 = arith.addf %83, %85 : vector<2x128xf32>
    %cst_45 = arith.constant 0.000000e+00 : f32
    %87 = vector.broadcast %cst_45 : f32 to vector<2x128xf32>
    %88 = arith.maximumf %86, %87 : vector<2x128xf32>
    %c3_46 = arith.constant 3 : index
    %c0_47 = arith.constant 0 : index
    %89 = memref.load %arg4[%c3_46, %c0_47] : memref<4x4xf32, #tpu.memory_space<smem>>
    %90 = vector.broadcast %89 : f32 to vector<2x128xf32>
    %91 = arith.mulf %7, %90 : vector<2x128xf32>
    %c3_48 = arith.constant 3 : index
    %c1_49 = arith.constant 1 : index
    %92 = memref.load %arg4[%c3_48, %c1_49] : memref<4x4xf32, #tpu.memory_space<smem>>
    %93 = vector.broadcast %92 : f32 to vector<2x128xf32>
    %94 = arith.mulf %14, %93 : vector<2x128xf32>
    %95 = arith.addf %91, %94 : vector<2x128xf32>
    %c3_50 = arith.constant 3 : index
    %c2_51 = arith.constant 2 : index
    %96 = memref.load %arg4[%c3_50, %c2_51] : memref<4x4xf32, #tpu.memory_space<smem>>
    %97 = vector.broadcast %96 : f32 to vector<2x128xf32>
    %98 = arith.mulf %21, %97 : vector<2x128xf32>
    %99 = arith.addf %95, %98 : vector<2x128xf32>
    %c3_52 = arith.constant 3 : index
    %c3_53 = arith.constant 3 : index
    %100 = memref.load %arg4[%c3_52, %c3_53] : memref<4x4xf32, #tpu.memory_space<smem>>
    %101 = vector.broadcast %100 : f32 to vector<2x128xf32>
    %102 = arith.mulf %28, %101 : vector<2x128xf32>
    %103 = arith.addf %99, %102 : vector<2x128xf32>
    %c3_54 = arith.constant 3 : index
    %104 = memref.load %arg5[%c3_54] : memref<4xf32, #tpu.memory_space<smem>>
    %105 = vector.broadcast %104 : f32 to vector<2x128xf32>
    %106 = arith.addf %103, %105 : vector<2x128xf32>
    %cst_55 = arith.constant 0.000000e+00 : f32
    %107 = vector.broadcast %cst_55 : f32 to vector<2x128xf32>
    %108 = arith.maximumf %106, %107 : vector<2x128xf32>
    %c0_56 = arith.constant 0 : index
    %c0_57 = arith.constant 0 : index
    %c0_58 = arith.constant 0 : index
    %c0_59 = arith.constant 0 : index
    %109 = vector.load %arg3[%c0_56, %c0_57, %c0_58, %c0_59] : memref<1x4x2x128xf32, #tpu.memory_space<vmem>>, vector<1x1x2x128xf32>
    %110 = vector.shape_cast %109 : vector<1x1x2x128xf32> to vector<2x128xf32>
    %c0_60 = arith.constant 0 : index
    %c2_61 = arith.constant 2 : index
    %c0_62 = arith.constant 0 : index
    %c0_63 = arith.constant 0 : index
    %111 = vector.load %arg3[%c0_60, %c2_61, %c0_62, %c0_63] : memref<1x4x2x128xf32, #tpu.memory_space<vmem>>, vector<1x1x2x128xf32>
    %112 = vector.shape_cast %111 : vector<1x1x2x128xf32> to vector<2x128xf32>
    %113 = arith.mulf %48, %110 : vector<2x128xf32>
    %114 = arith.mulf %88, %112 : vector<2x128xf32>
    %115 = arith.subf %113, %114 : vector<2x128xf32>
    %c0_64 = arith.constant 0 : index
    %c0_65 = arith.constant 0 : index
    %c0_66 = arith.constant 0 : index
    %c0_67 = arith.constant 0 : index
    %116 = vector.load %arg7[%c0_64, %c0_65, %c0_66, %c0_67] : memref<1x4x2x128xf32, #tpu.memory_space<vmem>>, vector<1x1x2x128xf32>
    %117 = vector.shape_cast %116 : vector<1x1x2x128xf32> to vector<2x128xf32>
    %118 = vector.shape_cast %115 : vector<2x128xf32> to vector<1x1x2x128xf32>
    tpu.vector_store %arg7[%c0_64, %c0_65, %c0_66, %c0_67], %118 {strides = array<i32>} : memref<1x4x2x128xf32, #tpu.memory_space<vmem>>, vector<1x1x2x128xf32>,
    %119 = arith.mulf %48, %112 : vector<2x128xf32>
    %120 = arith.mulf %88, %110 : vector<2x128xf32>
    %121 = arith.addf %119, %120 : vector<2x128xf32>
    %c0_68 = arith.constant 0 : index
    %c2_69 = arith.constant 2 : index
    %c0_70 = arith.constant 0 : index
    %c0_71 = arith.constant 0 : index
    %122 = vector.load %arg7[%c0_68, %c2_69, %c0_70, %c0_71] : memref<1x4x2x128xf32, #tpu.memory_space<vmem>>, vector<1x1x2x128xf32>
    %123 = vector.shape_cast %122 : vector<1x1x2x128xf32> to vector<2x128xf32>
    %124 = vector.shape_cast %121 : vector<2x128xf32> to vector<1x1x2x128xf32>
    tpu.vector_store %arg7[%c0_68, %c2_69, %c0_70, %c0_71], %124 {strides = array<i32>} : memref<1x4x2x128xf32, #tpu.memory_space<vmem>>, vector<1x1x2x128xf32>,
    %c0_72 = arith.constant 0 : index
    %c1_73 = arith.constant 1 : index
    %c0_74 = arith.constant 0 : index
    %c0_75 = arith.constant 0 : index
    %125 = vector.load %arg3[%c0_72, %c1_73, %c0_74, %c0_75] : memref<1x4x2x128xf32, #tpu.memory_space<vmem>>, vector<1x1x2x128xf32>
    %126 = vector.shape_cast %125 : vector<1x1x2x128xf32> to vector<2x128xf32>
    %c0_76 = arith.constant 0 : index
    %c3_77 = arith.constant 3 : index
    %c0_78 = arith.constant 0 : index
    %c0_79 = arith.constant 0 : index
    %127 = vector.load %arg3[%c0_76, %c3_77, %c0_78, %c0_79] : memref<1x4x2x128xf32, #tpu.memory_space<vmem>>, vector<1x1x2x128xf32>
    %128 = vector.shape_cast %127 : vector<1x1x2x128xf32> to vector<2x128xf32>
    %129 = arith.mulf %68, %126 : vector<2x128xf32>
    %130 = arith.mulf %108, %128 : vector<2x128xf32>
    %131 = arith.subf %129, %130 : vector<2x128xf32>
    %c0_80 = arith.constant 0 : index
    %c1_81 = arith.constant 1 : index
    %c0_82 = arith.constant 0 : index
    %c0_83 = arith.constant 0 : index
    %132 = vector.load %arg7[%c0_80, %c1_81, %c0_82, %c0_83] : memref<1x4x2x128xf32, #tpu.memory_space<vmem>>, vector<1x1x2x128xf32>
    %133 = vector.shape_cast %132 : vector<1x1x2x128xf32> to vector<2x128xf32>
    %134 = vector.shape_cast %131 : vector<2x128xf32> to vector<1x1x2x128xf32>
    tpu.vector_store %arg7[%c0_80, %c1_81, %c0_82, %c0_83], %134 {strides = array<i32>} : memref<1x4x2x128xf32, #tpu.memory_space<vmem>>, vector<1x1x2x128xf32>,
    %135 = arith.mulf %68, %128 : vector<2x128xf32>
    %136 = arith.mulf %108, %126 : vector<2x128xf32>
    %137 = arith.addf %135, %136 : vector<2x128xf32>
    %c0_84 = arith.constant 0 : index
    %c3_85 = arith.constant 3 : index
    %c0_86 = arith.constant 0 : index
    %c0_87 = arith.constant 0 : index
    %138 = vector.load %arg7[%c0_84, %c3_85, %c0_86, %c0_87] : memref<1x4x2x128xf32, #tpu.memory_space<vmem>>, vector<1x1x2x128xf32>
    %139 = vector.shape_cast %138 : vector<1x1x2x128xf32> to vector<2x128xf32>
    %140 = vector.shape_cast %137 : vector<2x128xf32> to vector<1x1x2x128xf32>
    tpu.vector_store %arg7[%c0_84, %c3_85, %c0_86, %c0_87], %140 {strides = array<i32>} : memref<1x4x2x128xf32, #tpu.memory_space<vmem>>, vector<1x1x2x128xf32>,
    return
  }
  func.func @transform_0(%arg0: i32, %arg1: i32) -> (i32, i32, i32, i32) {
    %c0_i32 = arith.constant 0 : i32
    %c0_i32_0 = arith.constant 0 : i32
    %c0_i32_1 = arith.constant 0 : i32
    return %arg0, %c0_i32, %arg1, %c0_i32_0 : i32, i32, i32, i32
  }
  func.func @transform_1(%arg0: i32, %arg1: i32) -> (i32, i32, i32, i32) {
    %c0_i32 = arith.constant 0 : i32
    %c0_i32_0 = arith.constant 0 : i32
    %c0_i32_1 = arith.constant 0 : i32
    return %arg0, %c0_i32, %arg1, %c0_i32_0 : i32, i32, i32, i32
  }
  func.func @transform_2(%arg0: i32, %arg1: i32) -> (i32, i32) {
    %c0_i32 = arith.constant 0 : i32
    %c0_i32_0 = arith.constant 0 : i32
    %c0_i32_1 = arith.constant 0 : i32
    return %c0_i32, %c0_i32_0 : i32, i32
  }
  func.func @transform_3(%arg0: i32, %arg1: i32) -> i32 {
    %c0_i32 = arith.constant 0 : i32
    %c0_i32_0 = arith.constant 0 : i32
    return %c0_i32 : i32
  }
  func.func @transform_4(%arg0: i32, %arg1: i32) -> i32 {
    %c0_i32 = arith.constant 0 : i32
    %c0_i32_0 = arith.constant 0 : i32
    return %c0_i32 : i32
  }
  func.func @transform_5(%arg0: i32, %arg1: i32) -> (i32, i32, i32, i32) {
    %c0_i32 = arith.constant 0 : i32
    %c0_i32_0 = arith.constant 0 : i32
    %c0_i32_1 = arith.constant 0 : i32
    return %arg0, %c0_i32, %arg1, %c0_i32_0 : i32, i32, i32, i32
  }
}

</mosaic_0001>

<bundles_post_ra>
// kernel: tpu_custom_call.1
= control target key start
LH: loop header
LB: loop body
LE: loop exit
PB: predicated region body
PF: predicated region fallthrough
CT: control target
= control target key end

     0   :  { %s1218_s0 = inlined_call_operand.hbm [shape: f32[2,4,2,128], index: 0, kind: input, shape index: {}]   ;;  %s1219_s1 = inlined_call_operand.hbm [shape: f32[2,4,2,128], index: 1, kind: input, shape index: {}]   ;;  %s1220_s2 = inlined_call_operand.vmem [shape: f32[4,4], index: 2, kind: input, shape index: {}]   ;;  %s1221_s3 = inlined_call_operand.vmem [shape: f32[4], index: 3, kind: input, shape index: {}]   ;;  %s1222_s4 = inlined_call_operand.<no memory space> [shape: f32[1], index: 4, kind: input, shape index: {}]   ;;  %s1223_s5 = inlined_call_operand.hbm [shape: f32[2,4,2,128], index: 5, kind: output, shape index: {}]  }
   0x1   :  { %1233 = sst [smem:[#allocation20_spill]] %s1218_s0 }
   0x2   :  { %1234 = sst [smem:[#allocation21_spill]] %s1220_s2 }
   0x3   :  { %1235 = sst [smem:[#allocation22_spill]] %s1221_s3 }
   0x4   :  { %10 = sst [smem:[#allocation2]] %s1222_s4 }
   0x5   :  { %11 = vsyncpa [#allocation4], 0 }
   0x6   :  { %13 = vsyncpa [#allocation4 + $0x1], 0 }
   0x7   :  { %14 = vsyncpa [#allocation8], 0 }
   0x8   :  { %16 = vsyncpa [#allocation8 + $0x1], 0 }
   0x9   :  { %17 = vsyncpa [#allocation6], 0 }
   0xa   :  { %18 = vsyncpa [#allocation11], 0 }
   0xb   :  { %19 = vsyncpa [#allocation5], 0 }
   0xc   :  { %21 = vsyncpa [#allocation5 + $0x1], 0  ;;  %s968_s20 = smov 0   ;;  %s970_s21 = smov 0  }
   0xd   :  { %s972_s22 = smov 0   ;;  %s974_s23 = smov 0  }
   0xe   :  { %s976_s24 = smov 0   ;;  %s978_s25 = smov 0  }
   0xf LB: > { %s601_s4 = sadd.s32 4294967295, %s924_s25   ;;  %s602_s26 = sadd.s32 4294967294, %s924_s25   ;;  %s924_s25 = sphi %s978_s25, %s27_s25   ;;  %s920_s24 = sphi %s976_s24, %s1264_s24   ;;  %s916_s23 = sphi %s974_s23, %s1263_s23   ;;  %s912_s22 = sphi %s972_s22, %s1262_s22   ;;  %s908_s21 = sphi %s970_s21, %s1261_s21   ;;  %s904_s20 = sphi %s968_s20, %s1260_s20  }
  0x10   : > { %s48_s27 = sadd.s32 1, %s912_s22  ;;  %p55_p0 = scmp.ne.s32.totalorder %s912_s22, %s908_s21 }
  0x11   : > { %p56_p1 = scmp.eq.s32.totalorder %s924_s25, 0  ;;  %p61_p2 = scmp.ne.s32.totalorder %s908_s21, %s904_s20 }
  0x12   : > { %p1006_p3 = scmp.eq.s32.totalorder %s601_s4, 0  ;;  %p178_p4 = scmp.eq.s32.totalorder %s601_s4, 1 }
  0x13   : > { %p1010_p5 = por %p56_p1, %p55_p0  ;;  %p184_p6 = scmp.eq.s32.totalorder %s602_s26, 1 }
  0x14   : > { %s1236_s28 = scalar_select %p1006_p3, 1, 0 }
  0x15   : > { %p1016_p7 = por %p1006_p3, %p61_p2  ;;  %p1020_p8 = por %p178_p4, %p55_p0 }
  0x16   : > { %p1024_p9 = por %p184_p6, %p61_p2  ;;  %p603_p10 = scmp.ge.s32.totalorder %s924_s25, 1 }
  0x17   : > { %s1238_s30 = scalar_select %p1016_p7, 1, 0 }
  0x18   : > { %s1239_s6 = scalar_select %p1020_p8, 1, 0 }
  0x19   : > { %s1240_s7 = scalar_select %p1024_p9, 1, 0 }
  0x1a   : > { %p191_p11 = scmp.lt.s32.totalorder %s924_s25, 3  ;;  %s1241_s2 = sld [smem:[#allocation21_spill]] }
  0x1b   : > { %p688_p0 = scmp.lt.s32.totalorder %s924_s25, 2  ;;  %s1243_s3 = sld [smem:[#allocation22_spill]] }
  0x1c   : > { %p1033_p12 = pnand %p603_p10, %p191_p11 }
  0x1d   : > { %p1046_p2 = pnand %p688_p0, %p1010_p5 }
  0x1e   : > { %s1242_s11 = scalar_select %p1033_p12, 1, 0 }
  0x1f   : > { %p668_p1 = pneg %p1033_p12 }
  0x20   : > { %s204_s10 = sshll.u32 %s1241_s2, 4  ;;  %s205_s10 = int_to_ptr.vmem [resolvable:$true] %s204_s10 }
  0x21   : > { %s215_s14 = sshll.u32 %s1243_s3, 4  ;;  %p1052_p4 = pnand %p668_p1, %p1006_p3  ;;  %s216_s14 = int_to_ptr.vmem [resolvable:$true] %s215_s14 }
  0x22   : > { %s1244_s15 = scalar_select %p1046_p2, 1, 0 }
  0x23   : > { %s746_s17 = scalar_lea.vmem %s205_s10, 64  ;;  %p748_p10 = pneg %p1052_p4 }
  0x24   : > { %p747_p6 = scmp.ne.s32.totalorder %s205_s10, %s746_s17  ;;  %p754_p9 = scmp.lt.s32.totalorder %s205_s10, %s205_s10 }
  0x25   : > { %p755_p8 = scmp.lt.s32.totalorder %s746_s17, %s746_s17 }
  0x26   : > { %p749_p11 = pnand %p748_p10, %p747_p6 }
  0x27   : > { %p756_p7 = por %p755_p8, %p754_p9 }
  0x28   : > { %p750_p13 = pneg %p749_p11 }
  0x2a   : > { %p757_p5 = pnand %p756_p7, %p750_p13 }
  0x2c   : > { %760 = shalt.err (!%p757_p5)
}
  0x2d   : > { %s926_s18 = smov [#allocation9]   ;;  %s761_s19 = scalar_lea.vmem %s216_s14, 16 }
  0x2e   : > { %671 = dma.vmem_to_smem (!%p1052_p4), %s205_s10, 64, %s926_s18, [#allocation6]  }
  0x2f   : > { %p762_p0 = scmp.ne.s32.totalorder %s216_s14, %s761_s19  ;;  %p769_p12 = scmp.lt.s32.totalorder %s216_s14, %s216_s14 }
  0x30   : > { %p770_p2 = scmp.lt.s32.totalorder %s761_s19, %s761_s19 }
  0x31   : > { %p764_p1 = pnand %p762_p0, %p748_p10 }
  0x32   : > { %p771_p6 = por %p770_p2, %p769_p12 }
  0x33   : > { %p765_p3 = pneg %p764_p1 }
  0x35   : > { %p772_p11 = pnand %p771_p6, %p765_p3 }
  0x37   : > { %775 = shalt.err (!%p772_p11)
}
  0x38   : > { %s927_s4 = smov [#allocation10]   ;;  %s39_s26 = sadd.s32 1, %s920_s24 }
  0x39   : > { %674 = dma.vmem_to_smem (!%p1052_p4), %s216_s14, 16, %s927_s4, [#allocation11]  }
  0x3a   : > { %s1064_s29 = sand.u32 1, %s912_s22   ;;  %p41_p3 = scmp.ge.s32.totalorder %s39_s26, 2 }
  0x3b   : > { %s1231_s8 = sshll.u32 %s1064_s29, 3  ;;  %s1230_s9 = sshll.u32 %s920_s24, 7 }
  0x3c   : > { %s1266_s26 = smov (%p41_p3, %s39_s26), 0  ;;  %s1247_s0 = sld [smem:[#allocation20_spill]] }
  0x3d   : > { %1246 = sst [smem:[#allocation18_spill]] %s1266_s26  ;;  %s43_s16 = ssub.s32 %s920_s24, %s1266_s26 }
  0x3e   : > { %s233_s14 = scalar_lea.vmem [#allocation3], %s1231_s8  ;;  %p46_p7 = scmp.eq.s32.totalorder %s43_s16, 0 }
  0x3f   : > { %s241_s17 = sshll.u32 %s233_s14, 4  ;;  %s230_s19 = scalar_lea.sflag [#allocation4], %s1064_s29  ;;  %s242_s17 = int_to_ptr.vmem [resolvable:$true] %s241_s17 }
  0x40   : > { %s1082_s18 = scalar_select %p46_p7, %s912_s22, %s48_s27  }
  0x41   : > { %p1249_p8 = scmp.ne.s32.totalorder %s1244_s15, 0  ;;  %s789_s4 = scalar_lea.vmem %s242_s17, 128 }
  0x42   : > { %s240_s13 = scalar_lea.hbm %s1247_s0, %s1230_s9  ;;  %1248 = sst [smem:[#allocation19_spill]] %s1082_s18 }
  0x43   : > { %p778_p9 = pneg %p1249_p8  ;;  %p790_p12 = scmp.ne.s32.totalorder %s242_s17, %s789_s4 }
  0x44   : > { %s928_s10 = smov [#allocation3]  }
  0x45   : > { %p792_p13 = pnand %p790_p12, %p778_p9  ;;  %s794_s12 = sshll.u32 %s928_s10, 4  ;;  %s795_s12 = int_to_ptr.vmem [resolvable:$false] %s794_s12 }
  0x46   : > { %s796_s9 = scalar_lea.vmem %s795_s12, 256  ;;  %p797_p4 = scmp.lt.s32.totalorder %s242_s17, %s795_s12 }
  0x47   : > { %p793_p2 = pneg %p792_p13  ;;  %p798_p10 = scmp.lt.s32.totalorder %s796_s9, %s789_s4 }
  0x49   : > { %p799_p5 = por %p798_p10, %p797_p4 }
  0x4b   : > { %p800_p0 = pnand %p799_p5, %p793_p2 }
  0x4d   : > { %803 = shalt.err (!%p800_p0)
}
  0x4e   : > { %s929_s27 = smov 32   ;;  %s930_s16 = smov 2  }
  0x4f   : > { %678 = dma.hbm_to_vmem [thread:$0]  (!%p1249_p8), %s240_s13, 128, %s242_s17, %s230_s19, %s929_s27, %s929_s27, %s930_s16  }
  0x50   : > { %s1250_s14 = sshll.u32 %s920_s24, 7  ;;  %s1251_s2 = sshll.u32 %s1064_s29, 3 }
  0x51   : > { %s262_s10 = scalar_lea.hbm %s1219_s1, %s1250_s14  ;;  %s255_s12 = scalar_lea.vmem [#allocation7], %s1251_s2 }
  0x52   : > { %s263_s9 = sshll.u32 %s255_s12, 4  ;;  %s252_s4 = scalar_lea.sflag [#allocation8], %s1064_s29  ;;  %s264_s9 = int_to_ptr.vmem [resolvable:$true] %s263_s9 }
  0x53   : > { %s817_s3 = scalar_lea.vmem %s264_s9, 128  ;;  %s931_s26 = smov [#allocation7]  }
  0x54   : > { %p818_p1 = scmp.ne.s32.totalorder %s264_s9, %s817_s3  ;;  %s822_s18 = sshll.u32 %s931_s26, 4  ;;  %s823_s18 = int_to_ptr.vmem [resolvable:$false] %s822_s18 }
  0x55   : > { %s824_s13 = scalar_lea.vmem %s823_s18, 256  ;;  %p825_p3 = scmp.lt.s32.totalorder %s264_s9, %s823_s18 }
  0x56   : > { %p820_p6 = pnand %p818_p1, %p778_p9  ;;  %p826_p7 = scmp.lt.s32.totalorder %s824_s13, %s817_s3 }
  0x58   : > { %p821_p11 = pneg %p820_p6  ;;  %p827_p12 = por %p826_p7, %p825_p3 }
  0x5a   : > { %p828_p13 = pnand %p827_p12, %p821_p11 }
  0x5c   : > { %831 = shalt.err (!%p828_p13)
}
  0x5d   : > { %681 = dma.hbm_to_vmem [thread:$0]  (!%p1249_p8), %s262_s10, 128, %s264_s9, %s252_s4, %s929_s27, %s929_s27, %s930_s16  }
  0x5e   : > { %p1252_p2 = scmp.ne.s32.totalorder %s1242_s11, 0 }
  0x5f   : > { %s1108_s0 = sand.u32 (!%p1252_p2), 1, %s908_s21   ;;  %p1253_p9 = scmp.ne.s32.totalorder (!%p1252_p2), %s1238_s30, 0 }
  0x60   : > { %275 = sbr.rel (%p1252_p2) target bundleno = 165 (0xa5), region = 40  ;;  %s1111_s2 = sshll.u32 (!%p1252_p2), %s1108_s0, 3 }
  0x61   : > { %s278_s26 = scalar_lea.sflag (!%p1252_p2), [#allocation4], %s1108_s0  ;;  %s281_s3 = scalar_lea.vmem (!%p1252_p2), [#allocation3], %s1111_s2 }
  0x65   : > { %883 = dma.done.wait (%p1253_p9), %s278_s26, 128  }
  0x66   : > { %885 = vsyncadd (%p1253_p9), %s278_s26, 4294967168  ;;  %s287_s11 = scalar_lea.sflag [#allocation8], %s1108_s0  ;;  %s1121_s15 = scalar_lea.vmem [#allocation7], %s1111_s2 }
  0x67   : > { %887 = dma.done.wait (%p1253_p9), %s287_s11, 128  }
  0x68   : > { %889 = vsyncadd (%p1253_p9), %s287_s11, 4294967168  ;;  %p1254_p8 = scmp.ne.s32.totalorder %s1236_s28, 0 }
  0x6a   : > { %891 = dma.done.wait (%p1254_p8), [#allocation6], 64  }
  0x6b   : > { %893 = vsyncadd (%p1254_p8), [#allocation6], 4294967232 }
  0x6c   : > { %895 = dma.done.wait (%p1254_p8), [#allocation11], 16  }
  0x6d   : > { %897 = vsyncadd (%p1254_p8), [#allocation11], 4294967280 }
  0x6e   : > { %303 = sfence }
  0x6f   : > { %s331_s29 = sld [smem:[#allocation2]]  ;;  %v332_v0 = vld [vmem:[%s281_s3] sm:$0x3]  ;;  %v619_v1 = vld [vmem:[%s281_s3 + $0x2] sm:$0x3]  ;;  %p1255_p10 = scmp.ne.s32.totalorder %s1239_s6, 0 }
  0x70   : > { %s352_s8 = sld [smem:[#allocation9]]  ;;  %v620_v2 = vld [vmem:[%s281_s3 + $0x4] sm:$0x3]  ;;  %v621_v3 = vld [vmem:[%s281_s3 + $0x6] sm:$0x3]  ;;  %vm333_vm0 = vcmp.ge.f32.partialorder %v332_v0, 0.0 }
  0x71   : > { %s622_s30 = sld [smem:[#allocation9 + $0x1]]  ;;  %vm339_vm1 = vcmp.ge.f32.partialorder %v619_v1, 0.0  ;;  %vm344_vm2 = vcmp.ge.f32.partialorder %v620_v2, 0.0  ;;  %vm349_vm3 = vcmp.ge.f32.partialorder %v621_v3, 0.0  ;;  %v428_v44 = vld [vmem:[%s1121_s15] sm:$0x3] }
  0x72   : > { %s623_s17 = sld [smem:[#allocation9 + $0x2]]  ;;  %v640_v47 = vld [vmem:[%s1121_s15 + $0x4] sm:$0x3] }
  0x73   : > { %s624_s18 = sld [smem:[#allocation9 + $0x3]] }
  0x74   : > { %s1135_s19 = sld [smem:[#allocation10]] }
  0x75   : > { %v334_v4 = vstv %s331_s29  ;;  %s630_s28 = sld [smem:[#allocation9 + $0x100]] }
  0x76   : > { %v335_v5 = vmul.f32 %v334_v4, %v332_v0  ;;  %v340_v6 = vmul.f32 %v619_v1, %v334_v4  ;;  %v345_v7 = vmul.f32 %v620_v2, %v334_v4  ;;  %v350_v8 = vmul.f32 %v621_v3, %v334_v4  ;;  %s631_s27 = sld [smem:[#allocation9 + $0x101]] }
  0x77   : > { %v353_v9 = vstv %s352_s8  ;;  %s632_s16 = sld [smem:[#allocation9 + $0x102]]  ;;  %v356_v15 = vstv %s622_s30 }
  0x78   : > { %v336_v10 = vsel %vm333_vm0, %v332_v0, %v335_v5  ;;  %v341_v11 = vsel %vm339_vm1, %v619_v1, %v340_v6  ;;  %v1137_v12 = vsel %vm344_vm2, %v620_v2, %v345_v7  ;;  %v1139_v13 = vsel %vm349_vm3, %v621_v3, %v350_v8  ;;  %s633_s14 = sld [smem:[#allocation9 + $0x103]] }
  0x79   : > { %v354_v14 = vmul.f32 %v353_v9, %v336_v10  ;;  %v360_v16 = vstv %s623_s17  ;;  %v357_v17 = vmul.f32 %v356_v15, %v341_v11  ;;  %v364_v19 = vstv %s624_s18  ;;  %s1142_s10 = sld [smem:[#allocation10 + $0x2]]  ;;  %s330_s17 = scalar_lea.vmem [#allocation12], %s1111_s2 }
  0x7a   : > { %v361_v18 = vmul.f32 %v360_v16, %v1137_v12  ;;  %s625_s12 = sld [smem:[#allocation9 + $0x80]]  ;;  %v365_v21 = vmul.f32 %v364_v19, %v1139_v13  ;;  %v368_v28 = vstv %s1135_s19  ;;  %s469_s18 = sshll.u32 %s330_s17, 4  ;;  %s1165_s18 = int_to_ptr.vmem [resolvable:$true] %s469_s18 }
  0x7b   : > { %v358_v20 = vadd.f32 %v357_v17, %v354_v14  ;;  %v391_v22 = vstv %s630_s28  ;;  %s626_s9 = sld [smem:[#allocation9 + $0x81]]  ;;  %s653_s19 = sshll.u32 %s916_s23, 7 }
  0x7c   : > { %v392_v23 = vmul.f32 %v391_v22, %v336_v10  ;;  %v394_v24 = vstv %s631_s27  ;;  %s627_s4 = sld [smem:[#allocation9 + $0x82]]  ;;  %s1170_s27 = scalar_lea.hbm %s1223_s5, %s653_s19 }
  0x7d   : > { %v362_v25 = vadd.f32 %v361_v18, %v358_v20  ;;  %v395_v26 = vmul.f32 %v394_v24, %v341_v11  ;;  %v398_v27 = vstv %s632_s16  ;;  %s628_s13 = sld [smem:[#allocation9 + $0x83]]  ;;  %s832_s16 = scalar_lea.vmem %s1165_s18, 128 }
  0x7e   : > { %v399_v29 = vmul.f32 %v398_v27, %v1137_v12  ;;  %v402_v30 = vstv %s633_s14  ;;  %s1147_s26 = sld [smem:[#allocation10 + $0x1]]  ;;  %p833_p4 = scmp.ne.s32.totalorder %s1165_s18, %s832_s16 }
  0x7f   : > { %v366_v31 = vadd.f32 %v365_v21, %v362_v25  ;;  %v396_v32 = vadd.f32 %v395_v26, %v392_v23  ;;  %v403_v33 = vmul.f32 %v402_v30, %v1139_v13  ;;  %s635_s3 = sld [smem:[#allocation9 + $0x180]]  ;;  %v406_v39 = vstv %s1142_s10  ;;  %s932_s23 = smov [#allocation12]  }
  0x80   : > { %v372_v34 = vstv %s625_s12  ;;  %s636_s11 = sld [smem:[#allocation9 + $0x181]]  ;;  %p834_p5 = pnand %p833_p4, %p1255_p10 }
  0x81   : > { %v369_v35 = vadd.f32 %v368_v28, %v366_v31  ;;  %v400_v36 = vadd.f32 %v399_v29, %v396_v32  ;;  %v373_v37 = vmul.f32 %v372_v34, %v336_v10  ;;  %v375_v38 = vstv %s626_s9  ;;  %s637_s29 = sld [smem:[#allocation9 + $0x182]]  ;;  %s836_s14 = sshll.u32 %s932_s23, 4  ;;  %s837_s14 = int_to_ptr.vmem [resolvable:$false] %s836_s14 }
  0x82   : > { %v376_v40 = vmul.f32 %v375_v38, %v341_v11  ;;  %v379_v41 = vstv %s627_s4  ;;  %s638_s8 = sld [smem:[#allocation9 + $0x183]]  ;;  %p835_p0 = pneg %p834_p5 }
  0x83   : > { %v370_v42 = vmax.f32 %v369_v35, 0.0  ;;  %v404_v43 = vadd.f32 %v403_v33, %v400_v36  ;;  %v380_v45 = vmul.f32 %v379_v41, %v1137_v12  ;;  %v383_v46 = vstv %s628_s13  ;;  %s1155_s30 = sld [smem:[#allocation10 + $0x3]]  ;;  %s838_s10 = scalar_lea.vmem %s837_s14, 256 }
  0x84   : > { %v377_v48 = vadd.f32 %v376_v40, %v373_v37  ;;  %v384_v49 = vmul.f32 %v383_v46, %v1139_v13  ;;  %v387_v51 = vstv %s1147_s26  ;;  %p839_p1 = scmp.lt.s32.totalorder %s1165_s18, %s837_s14  ;;  %p840_p6 = scmp.lt.s32.totalorder %s838_s10, %s832_s16 }
  0x85   : > { %v407_v50 = vadd.f32 %v406_v39, %v404_v43  ;;  %v410_v52 = vstv %s635_s3  ;;  %v431_v53 = vmul.f32 %v428_v44, %v370_v42  ;;  %v435_v58 = vmul.f32 %v640_v47, %v370_v42 }
  0x86   : > { %v381_v54 = vadd.f32 %v380_v45, %v377_v48  ;;  %v411_v55 = vmul.f32 %v410_v52, %v336_v10  ;;  %v413_v56 = vstv %s636_s11  ;;  %p841_p11 = por %p840_p6, %p839_p1 }
  0x87   : > { %v408_v57 = vmax.f32 %v407_v50, 0.0  ;;  %v414_v59 = vmul.f32 %v413_v56, %v341_v11  ;;  %v417_v60 = vstv %s637_s29  ;;  %v642_v11 = vld [vmem:[%s1121_s15 + $0x2] sm:$0x3] }
  0x88   : > { %v385_v61 = vadd.f32 %v384_v49, %v381_v54  ;;  %v418_v62 = vmul.f32 %v417_v60, %v1137_v12  ;;  %v421_v63 = vstv %s638_s8  ;;  %v643_v12 = vld [vmem:[%s1121_s15 + $0x6] sm:$0x3]  ;;  %s455_s15 = scalar_lea.sflag [#allocation5], %s1108_s0  ;;  %p842_p3 = pnand %p841_p11, %p835_p0 }
  0x89   : > { %v432_v0 = vmul.f32 %v640_v47, %v408_v57  ;;  %v436_v1 = vmul.f32 %v428_v44, %v408_v57  ;;  %v415_v2 = vadd.f32 %v414_v59, %v411_v55  ;;  %v422_v3 = vmul.f32 %v421_v63, %v1139_v13 }
  0x8a   : > { %v388_v4 = vadd.f32 %v387_v51, %v385_v61  ;;  %v425_v8 = vstv %s1155_s30 }
  0x8b   : > { %v433_v5 = vsub.f32 %v431_v53, %v432_v0  ;;  %v437_v6 = vadd.f32 %v436_v1, %v435_v58  ;;  %v419_v7 = vadd.f32 %v418_v62, %v415_v2 }
  0x8c   : > { %v389_v9 = vmax.f32 %v388_v4, 0.0 }
  0x8d   : > { %434 = vst [vmem:[%s330_s17] sm:$0x3] %v433_v5  ;;  %641 = vst [vmem:[%s330_s17 + $0x4] sm:$0x3] %v437_v6  ;;  %v423_v10 = vadd.f32 %v422_v3, %v419_v7 }
  0x8e   : > { %v444_v16 = vmul.f32 %v642_v11, %v389_v9  ;;  %v449_v13 = vmul.f32 %v643_v12, %v389_v9 }
  0x8f   : > { %v426_v14 = vadd.f32 %v425_v8, %v423_v10 }
  0x91   : > { %v427_v15 = vmax.f32 %v426_v14, 0.0 }
  0x93   : > { %v445_v17 = vmul.f32 %v643_v12, %v427_v15  ;;  %v450_v18 = vmul.f32 %v642_v11, %v427_v15 }
  0x95   : > { %v446_v19 = vsub.f32 %v444_v16, %v445_v17  ;;  %v451_v20 = vadd.f32 %v450_v18, %v449_v13 }
  0x97   : > { %644 = vst [vmem:[%s330_s17 + $0x2] sm:$0x3] %v446_v19  ;;  %645 = vst [vmem:[%s330_s17 + $0x6] sm:$0x3] %v451_v20 }
  0x98   : > { %845 = shalt.err (!%p842_p3)
}
  0x99   : > { %s846_s12 = scalar_lea.hbm %s1170_s27, 128  ;;  %s850_s13 = scalar_lea.hbm %s1223_s5, 256 }
  0x9a   : > { %p847_p7 = scmp.ne.s32.totalorder %s1170_s27, %s846_s12  ;;  %p851_p2 = scmp.lt.s32.totalorder %s1170_s27, %s1223_s5 }
  0x9b   : > { %p852_p9 = scmp.lt.s32.totalorder %s850_s13, %s846_s12 }
  0x9c   : > { %p848_p12 = pnand %p847_p7, %p1255_p10 }
  0x9d   : > { %p853_p8 = por %p852_p9, %p851_p2 }
  0x9e   : > { %p849_p13 = pneg %p848_p12 }
  0xa0   : > { %p854_p4 = pnand %p853_p8, %p849_p13 }
  0xa2   : > { %857 = shalt.err (!%p854_p4)
}
  0xa3   : > { %s933_s11 = smov 32   ;;  %s934_s29 = smov 2  }
  0xa4   : > { %666 = dma.vmem_to_hbm [thread:$0]  (%p1255_p10), %s1165_s18, 128, %s1170_s27, %s455_s15, %s933_s11, %s933_s11, %s934_s29  }
  0xa5 PF: > { %s484_s8 = sand.u32 1, %s904_s20   ;;  %p1256_p5 = scmp.ne.s32.totalorder %s1240_s7, 0 }
  0xa6   : > { %p1257_p0 = scmp.ge.s32.totalorder %s924_s25, 2  ;;  %s485_s30 = scalar_lea.sflag [#allocation5], %s484_s8 }
  0xa8   : > { %p683_p1 = pnand %p1257_p0, %p1256_p5 }
  0xaa   : > { %p684_p6 = pneg %p683_p1 }
  0xac   : > { %899 = dma.done.wait (%p684_p6), %s485_s30, 128  }
  0xad   : > { %901 = vsyncadd (%p684_p6), %s485_s30, 4294967168  ;;  %s27_s25 = sadd.s32 1, %s924_s25   ;;  %s1258_s6 = sld [smem:[#allocation19_spill]] }
  0xae   : > { %p24_p11 = scmp.ge.s32.totalorder %s27_s25, 4   ;;  %s1259_s0 = sld [smem:[#allocation18_spill]] }
  0xaf   : > { %s1260_s20 = smov %s908_s21  ;;  %s1261_s21 = smov %s912_s22 }
  0xb0   : > { %s1263_s23 = smov %s920_s24  ;;  %26 = sbr.rel (!%p24_p11) target bundleno = 15 (0xf), region = 116 }
  0xb3   : > { %s1262_s22 = smov %s1258_s6 }
  0xb4   : > { %s1264_s24 = smov %s1259_s0 }
  0xb5   :  { %490 = vsyncpa [#allocation4], 1 }
  0xb6   :  { %492 = vsyncpa [#allocation4 + $0x1], 1 }
  0xb7   :  { %493 = vsyncpa [#allocation8], 1 }
  0xb8   :  { %495 = vsyncpa [#allocation8 + $0x1], 1 }
  0xb9   :  { %496 = vsyncpa [#allocation5], 1 }
  0xba   :  { %498 = vsyncpa [#allocation5 + $0x1], 1 }
  0xbb   :  { %499 = vsyncpa [#allocation6], 1 }
  0xbc   :  { %501 = vsyncpa [#allocation6 + $0x1], 1 }
  0xbd   :  { %502 = vsyncpa [#allocation11], 1 }

</bundles_post_ra>
